<compile_context>
chip_gen: v7x
topology: tpu7x:2x2x1
jax: 0.10.0
libtpu: 0.0.40
codegen_flags: <defaults>
</compile_context>

<pallas_src>
import functools

import jax
import jax.numpy as jnp
from jax import lax
from jax.experimental import pallas as pl
from jax.experimental.pallas import tpu as pltpu


def _attention_loss_kernel(logit_ref, mask_ref, sum_ref, cnt_ref, *,
                           num_groups, m_total, tm):
    p = pl.program_id(0)          # core-split axis ("parallel")
    g = pl.program_id(1)          # group (unique label row)
    m = pl.program_id(2)          # lane tile within the group
    gc = pl.num_programs(1)       # groups per core

    @pl.when(jnp.logical_and(g == 0, m == 0))
    def _():
        sum_ref[...] = jnp.zeros_like(sum_ref)
        cnt_ref[...] = jnp.zeros_like(cnt_ref)

    x = logit_ref[...].astype(jnp.float32)        # (C, TM): classes on sublanes
    mask = mask_ref[...].astype(jnp.float32)      # (C, 1):  row 0 is always 0

    # log-softmax pieces, reduced over the small class/sublane axis.
    mx = jnp.max(x, axis=0, keepdims=True)                       # (1, TM)
    sh = x - mx
    lse = jnp.log(jnp.sum(jnp.exp(sh), axis=0, keepdims=True))   # (1, TM)

    mask_sum = jnp.sum(mask, axis=0, keepdims=True)              # (1, 1)
    valid = mask_sum > 0.0
    valid_f = valid.astype(jnp.float32)
    inv_den = jnp.where(
        valid, pl.reciprocal(jnp.maximum(mask_sum, 1.0), approx=True), 0.0)

    # sum_c mask[c] * log_softmax[c, n] == msum[n] - mask_sum * lse[n]
    msum = jnp.sum(mask * sh, axis=0, keepdims=True)             # (1, TM)
    # Per-row contribution: -m_scores / mask_sum when valid, else 0.
    contrib = valid_f * lse - inv_den * msum                     # (1, TM)

    # Gate lanes past the real number of rows, and groups past G (core split).
    lane = lax.broadcasted_iota(jnp.int32, (1, tm), 1)
    in_range = (m * tm + lane) < m_total
    real_group = (p * gc + g) < num_groups
    ok = jnp.logical_and(in_range, real_group)

    sum_ref[...] += jnp.where(ok, contrib, 0.0)
    cnt_ref[...] += jnp.where(jnp.logical_and(ok, valid), 1.0, 0.0)


@jax.jit
def attention_loss_pallas(logit, label):
    d0, d1, d2, d3, C = logit.shape
    K = C - 1
    G = d0 * d3          # unique label rows (batch x query position)
    M = d1 * d2          # rows sharing the same label mask

    # ---- glue: label-sized work only (no (N, K) broadcast through HBM) ----
    lab = label.reshape(-1, label.shape[-2], label.shape[-1])[:, :d3, :]
    lab = jnp.broadcast_to(lab, (d0, d3, K))                      # (d0, d3, K)
    mask_k = (lab > 0).astype(jnp.float32)
    mask_c = jnp.concatenate(
        [jnp.zeros((d0, d3, 1), jnp.float32), mask_k], axis=-1)   # class 0 := 0
    mask_c = mask_c.reshape(G, C)[:, :, None]                     # (G, C, 1)

    # One-time lane-major relayout: (G, C, M) with the big M axis on lanes.
    logit_t = jnp.transpose(logit, (0, 3, 4, 1, 2)).reshape(G, C, M)

    TM = M if M <= 1024 else 1024          # full dim, or a multiple of 128
    m_tiles = pl.cdiv(M, TM)
    n_cores = 2 if G >= 2 else 1
    gc = pl.cdiv(G, n_cores)

    def logit_map(p, g, m):
        return (jnp.minimum(p * gc + g, G - 1), 0, m)

    def mask_map(p, g, m):
        return (jnp.minimum(p * gc + g, G - 1), 0, 0)

    def out_map(p, g, m):
        return (p, 0, 0)

    kernel = functools.partial(
        _attention_loss_kernel, num_groups=G, m_total=M, tm=TM)

    sums, cnts = pl.pallas_call(
        kernel,
        out_shape=(
            jax.ShapeDtypeStruct((n_cores, 1, TM), jnp.float32),
            jax.ShapeDtypeStruct((n_cores, 1, TM), jnp.float32),
        ),
        grid_spec=pltpu.PrefetchScalarGridSpec(
            num_scalar_prefetch=0,
            grid=(n_cores, gc, m_tiles),
            in_specs=[
                pl.BlockSpec((None, C, TM), logit_map),
                pl.BlockSpec((None, C, 1), mask_map),
            ],
            out_specs=[
                pl.BlockSpec((None, 1, TM), out_map),
                pl.BlockSpec((None, 1, TM), out_map),
            ],
        ),
        compiler_params=pltpu.CompilerParams(
            dimension_semantics=("parallel", "arbitrary", "arbitrary"),
        ),
    )(logit_t, mask_c)

    # Final cross-lane / cross-core reduction + mean in the glue.
    loss = jnp.sum(sums) / jnp.sum(cnts)
    return loss


def attention_loss_ref(logit, label):
    """Pure-JAX reference matching the PyTorch forward."""
    logp = jax.nn.log_softmax(logit.astype(jnp.float32), axis=-1)
    scores = logp[..., 1:]
    lab = label.reshape(-1, 1, 1, label.shape[-2], label.shape[-1])
    lab = lab[:, :, :, : scores.shape[-2], :]
    lab = jnp.broadcast_to(lab, scores.shape)
    s = scores.reshape(-1, scores.shape[-1])
    l = lab.reshape(-1, lab.shape[-1])
    mask = (l > 0).astype(jnp.float32)
    mask_sum = mask.sum(-1)
    m_scores = (s * mask).sum(-1)
    valid = mask_sum > 0
    contrib = jnp.where(valid, -m_scores / jnp.where(valid, mask_sum, 1.0), 0.0)
    return contrib.sum() / valid.sum().astype(jnp.float32)


if __name__ == "__main__":
    key = jax.random.PRNGKey(0)
    k_logit, k_label = jax.random.split(key)

    # logit: (d0=2, d1=16, d2=8, d3=8, C=9); label: (d0=2, L2=16, K=8)
    # -> G = 16 groups, M = 128 rows per group (one full 128-lane tile each).
    logit = jax.random.normal(k_logit, (2, 16, 8, 8, 9), dtype=jnp.float32)
    # Positive and non-positive labels (some rows fully non-positive exercise
    # the mask_sum > 0 filter).
    label = jax.random.randint(k_label, (2, 16, 8), -3, 3).astype(jnp.float32)

    loss = attention_loss_pallas(logit, label)
    loss = jax.block_until_ready(loss)

    ref = attention_loss_ref(logit, label)
    # Tolerance covers pl.reciprocal(approx=True) for the per-group 1/mask_sum.
    assert jnp.allclose(loss, ref, rtol=5e-3, atol=5e-3), (loss, ref)

    # Mirror the PyTorch return signature: (loss, {'Attention Loss': loss.item()})
    result = (loss, {"Attention Loss": float(loss)})
    print("KERNEL_OK")
</pallas_src>

<mosaic_0001>
module attributes {stable_mosaic.version = 11 : i64} {
  func.func @_attention_loss_kernel(%arg0: i32, %arg1: i32, %arg2: i32, %arg3: memref<1x9x128xf32, #tpu.memory_space<vmem>>, %arg4: memref<1x9x1xf32, #tpu.memory_space<vmem>>, %arg5: memref<1x1x128xf32, #tpu.memory_space<vmem>>, %arg6: memref<1x1x128xf32, #tpu.memory_space<vmem>>) attributes {dimension_semantics = [#tpu.dimension_semantics<parallel>, #tpu.dimension_semantics<arbitrary>, #tpu.dimension_semantics<arbitrary>], iteration_bounds = array<i64: 2, 8, 1>, scalar_prefetch = 0 : i64, scratch_operands = 0 : i64, tpu.core_type = #tpu.core_type<tc>, window_params = [{transform_indices = @transform_0, window_bounds = array<i64: 1, 9, 128>}, {transform_indices = @transform_1, window_bounds = array<i64: 1, 9, 1>}, {transform_indices = @transform_2, window_bounds = array<i64: 1, 1, 128>}, {transform_indices = @transform_3, window_bounds = array<i64: 1, 1, 128>}]} {
    %c0_i32 = arith.constant 0 : i32
    %0 = arith.cmpi eq, %arg1, %c0_i32 : i32
    %c0_i32_0 = arith.constant 0 : i32
    %1 = arith.cmpi eq, %arg2, %c0_i32_0 : i32
    %2 = arith.andi %0, %1 : i1
    %3 = arith.extui %2 : i1 to i32
    %c0_i32_1 = arith.constant 0 : i32
    %4 = arith.cmpi ne, %3, %c0_i32_1 : i32
    scf.if %4 {
      %cst_29 = arith.constant 0.000000e+00 : f32
      %67 = vector.broadcast %cst_29 : f32 to vector<1x128xf32>
      %c0_30 = arith.constant 0 : index
      %c0_31 = arith.constant 0 : index
      %c0_32 = arith.constant 0 : index
      %68 = vector.load %arg5[%c0_30, %c0_31, %c0_32] : memref<1x1x128xf32, #tpu.memory_space<vmem>>, vector<1x1x128xf32>
      %69 = vector.shape_cast %68 : vector<1x1x128xf32> to vector<1x128xf32>
      %70 = vector.shape_cast %67 : vector<1x128xf32> to vector<1x1x128xf32>
      tpu.vector_store %arg5[%c0_30, %c0_31, %c0_32], %70 {strides = array<i32>} : memref<1x1x128xf32, #tpu.memory_space<vmem>>, vector<1x1x128xf32>,
      %cst_33 = arith.constant 0.000000e+00 : f32
      %71 = vector.broadcast %cst_33 : f32 to vector<1x128xf32>
      %c0_34 = arith.constant 0 : index
      %c0_35 = arith.constant 0 : index
      %c0_36 = arith.constant 0 : index
      %72 = vector.load %arg6[%c0_34, %c0_35, %c0_36] : memref<1x1x128xf32, #tpu.memory_space<vmem>>, vector<1x1x128xf32>
      %73 = vector.shape_cast %72 : vector<1x1x128xf32> to vector<1x128xf32>
      %74 = vector.shape_cast %71 : vector<1x128xf32> to vector<1x1x128xf32>
      tpu.vector_store %arg6[%c0_34, %c0_35, %c0_36], %74 {strides = array<i32>} : memref<1x1x128xf32, #tpu.memory_space<vmem>>, vector<1x1x128xf32>,
    } else {
    }
    %c0 = arith.constant 0 : index
    %c0_2 = arith.constant 0 : index
    %c0_3 = arith.constant 0 : index
    %5 = vector.load %arg3[%c0, %c0_2, %c0_3] : memref<1x9x128xf32, #tpu.memory_space<vmem>>, vector<1x9x128xf32>
    %6 = vector.shape_cast %5 : vector<1x9x128xf32> to vector<9x128xf32>
    %c0_4 = arith.constant 0 : index
    %c0_5 = arith.constant 0 : index
    %c0_6 = arith.constant 0 : index
    %7 = vector.load %arg4[%c0_4, %c0_5, %c0_6] : memref<1x9x1xf32, #tpu.memory_space<vmem>>, vector<1x9x1xf32>
    %8 = vector.shape_cast %7 : vector<1x9x1xf32> to vector<9x1xf32>
    %cst = arith.constant dense<0xFF800000> : vector<128xf32>
    %9 = vector.multi_reduction <maximumf>, %6, %cst [0] : vector<9x128xf32> to vector<128xf32>
    %10 = vector.shape_cast %9 : vector<128xf32> to vector<1x128xf32>
    %11 = vector.broadcast %10 : vector<1x128xf32> to vector<9x128xf32>
    %12 = arith.subf %6, %11 : vector<9x128xf32>
    %13 = math.exp %12 : vector<9x128xf32>
    %cst_7 = arith.constant dense<0.000000e+00> : vector<128xf32>
    %14 = vector.multi_reduction <add>, %13, %cst_7 [0] : vector<9x128xf32> to vector<128xf32>
    %15 = vector.shape_cast %14 : vector<128xf32> to vector<1x128xf32>
    %16 = math.log %15 : vector<1x128xf32>
    %cst_8 = arith.constant dense<0.000000e+00> : vector<1xf32>
    %17 = vector.multi_reduction <add>, %8, %cst_8 [0] : vector<9x1xf32> to vector<1xf32>
    %18 = vector.shape_cast %17 : vector<1xf32> to vector<1x1xf32>
    %cst_9 = arith.constant 0.000000e+00 : f32
    %19 = vector.broadcast %cst_9 : f32 to vector<1x1xf32>
    %20 = arith.cmpf ogt, %18, %19 : vector<1x1xf32>
    %21 = arith.extui %20 : vector<1x1xi1> to vector<1x1xi32>
    %22 = arith.sitofp %21 : vector<1x1xi32> to vector<1x1xf32>
    %cst_10 = arith.constant 1.000000e+00 : f32
    %23 = vector.broadcast %cst_10 : f32 to vector<1x1xf32>
    %24 = arith.maximumf %18, %23 : vector<1x1xf32>
    %25 = tpu.reciprocal %24 {approx = true} : vector<1x1xf32> -> vector<1x1xf32>
    %cst_11 = arith.constant 0.000000e+00 : f32
    %26 = vector.broadcast %cst_11 : f32 to vector<1x1xf32>
    %27 = arith.select %20, %25, %26 : vector<1x1xi1>, vector<1x1xf32>
    %28 = vector.broadcast %8 : vector<9x1xf32> to vector<9x128xf32>
    %29 = arith.mulf %28, %12 : vector<9x128xf32>
    %cst_12 = arith.constant dense<0.000000e+00> : vector<128xf32>
    %30 = vector.multi_reduction <add>, %29, %cst_12 [0] : vector<9x128xf32> to vector<128xf32>
    %31 = vector.shape_cast %30 : vector<128xf32> to vector<1x128xf32>
    %32 = vector.broadcast %22 : vector<1x1xf32> to vector<1x128xf32>
    %33 = arith.mulf %32, %16 : vector<1x128xf32>
    %34 = vector.broadcast %27 : vector<1x1xf32> to vector<1x128xf32>
    %35 = arith.mulf %34, %31 : vector<1x128xf32>
    %36 = arith.subf %33, %35 : vector<1x128xf32>
    %37 = tpu.iota {dimensions = array<i32: 1>} : vector<1x128xi32>
    %c128_i32 = arith.constant 128 : i32
    %38 = arith.muli %arg2, %c128_i32 : i32
    %39 = vector.broadcast %38 : i32 to vector<1x128xi32>
    %40 = arith.addi %39, %37 : vector<1x128xi32>
    %c128_i32_13 = arith.constant 128 : i32
    %41 = vector.broadcast %c128_i32_13 : i32 to vector<1x128xi32>
    %42 = arith.cmpi slt, %40, %41 : vector<1x128xi32>
    %c8_i32 = arith.constant 8 : i32
    %43 = arith.muli %arg0, %c8_i32 : i32
    %44 = arith.addi %43, %arg1 : i32
    %c16_i32 = arith.constant 16 : i32
    %45 = arith.cmpi slt, %44, %c16_i32 : i32
    %46 = vector.broadcast %45 : i1 to vector<1x128xi1>
    %47 = arith.andi %42, %46 : vector<1x128xi1>
    %c0_14 = arith.constant 0 : index
    %c0_15 = arith.constant 0 : index
    %c0_16 = arith.constant 0 : index
    %48 = vector.load %arg5[%c0_14, %c0_15, %c0_16] : memref<1x1x128xf32, #tpu.memory_space<vmem>>, vector<1x1x128xf32>
    %49 = vector.shape_cast %48 : vector<1x1x128xf32> to vector<1x128xf32>
    %cst_17 = arith.constant 0.000000e+00 : f32
    %50 = vector.broadcast %cst_17 : f32 to vector<1x128xf32>
    %51 = arith.select %47, %36, %50 : vector<1x128xi1>, vector<1x128xf32>
    %52 = arith.addf %49, %51 : vector<1x128xf32>
    %c0_18 = arith.constant 0 : index
    %c0_19 = arith.constant 0 : index
    %c0_20 = arith.constant 0 : index
    %53 = vector.load %arg5[%c0_18, %c0_19, %c0_20] : memref<1x1x128xf32, #tpu.memory_space<vmem>>, vector<1x1x128xf32>
    %54 = vector.shape_cast %53 : vector<1x1x128xf32> to vector<1x128xf32>
    %55 = vector.shape_cast %52 : vector<1x128xf32> to vector<1x1x128xf32>
    tpu.vector_store %arg5[%c0_18, %c0_19, %c0_20], %55 {strides = array<i32>} : memref<1x1x128xf32, #tpu.memory_space<vmem>>, vector<1x1x128xf32>,
    %c0_21 = arith.constant 0 : index
    %c0_22 = arith.constant 0 : index
    %c0_23 = arith.constant 0 : index
    %56 = vector.load %arg6[%c0_21, %c0_22, %c0_23] : memref<1x1x128xf32, #tpu.memory_space<vmem>>, vector<1x1x128xf32>
    %57 = vector.shape_cast %56 : vector<1x1x128xf32> to vector<1x128xf32>
    %58 = vector.broadcast %20 : vector<1x1xi1> to vector<1x128xi1>
    %59 = arith.andi %47, %58 : vector<1x128xi1>
    %cst_24 = arith.constant 1.000000e+00 : f32
    %cst_25 = arith.constant 0.000000e+00 : f32
    %60 = vector.broadcast %cst_24 : f32 to vector<1x128xf32>
    %61 = vector.broadcast %cst_25 : f32 to vector<1x128xf32>
    %62 = arith.select %59, %60, %61 : vector<1x128xi1>, vector<1x128xf32>
    %63 = arith.addf %57, %62 : vector<1x128xf32>
    %c0_26 = arith.constant 0 : index
    %c0_27 = arith.constant 0 : index
    %c0_28 = arith.constant 0 : index
    %64 = vector.load %arg6[%c0_26, %c0_27, %c0_28] : memref<1x1x128xf32, #tpu.memory_space<vmem>>, vector<1x1x128xf32>
    %65 = vector.shape_cast %64 : vector<1x1x128xf32> to vector<1x128xf32>
    %66 = vector.shape_cast %63 : vector<1x128xf32> to vector<1x1x128xf32>
    tpu.vector_store %arg6[%c0_26, %c0_27, %c0_28], %66 {strides = array<i32>} : memref<1x1x128xf32, #tpu.memory_space<vmem>>, vector<1x1x128xf32>,
    return
  }
  func.func @transform_0(%arg0: i32, %arg1: i32, %arg2: i32) -> (i32, i32, i32) {
    %c8_i32 = arith.constant 8 : i32
    %0 = arith.muli %arg0, %c8_i32 : i32
    %1 = arith.addi %0, %arg1 : i32
    %c15_i32 = arith.constant 15 : i32
    %2 = arith.minsi %1, %c15_i32 : i32
    %c0_i32 = arith.constant 0 : i32
    %c0_i32_0 = arith.constant 0 : i32
    return %2, %c0_i32, %arg2 : i32, i32, i32
  }
  func.func @transform_1(%arg0: i32, %arg1: i32, %arg2: i32) -> (i32, i32, i32) {
    %c8_i32 = arith.constant 8 : i32
    %0 = arith.muli %arg0, %c8_i32 : i32
    %1 = arith.addi %0, %arg1 : i32
    %c15_i32 = arith.constant 15 : i32
    %2 = arith.minsi %1, %c15_i32 : i32
    %c0_i32 = arith.constant 0 : i32
    %c0_i32_0 = arith.constant 0 : i32
    %c0_i32_1 = arith.constant 0 : i32
    return %2, %c0_i32, %c0_i32_0 : i32, i32, i32
  }
  func.func @transform_2(%arg0: i32, %arg1: i32, %arg2: i32) -> (i32, i32, i32) {
    %c0_i32 = arith.constant 0 : i32
    %c0_i32_0 = arith.constant 0 : i32
    %c0_i32_1 = arith.constant 0 : i32
    return %arg0, %c0_i32, %c0_i32_0 : i32, i32, i32
  }
  func.func @transform_3(%arg0: i32, %arg1: i32, %arg2: i32) -> (i32, i32, i32) {
    %c0_i32 = arith.constant 0 : i32
    %c0_i32_0 = arith.constant 0 : i32
    %c0_i32_1 = arith.constant 0 : i32
    return %arg0, %c0_i32, %c0_i32_0 : i32, i32, i32
  }
}

</mosaic_0001>

<bundles_post_ra>
// kernel: attention_loss_pallas.1
= control target key start
LH: loop header
LB: loop body
LE: loop exit
PB: predicated region body
PF: predicated region fallthrough
CT: control target
= control target key end

     0   :  { %s644_s12 = smov 0   ;;  %s646_s13 = smov 0   ;;  %s735_s0 = inlined_call_operand.vmem [shape: f32[16,9,128], index: 0, kind: input, shape index: {}]   ;;  %s736_s1 = inlined_call_operand.vmem [shape: f32[16,9,1], index: 1, kind: input, shape index: {}]   ;;  %s737_s2 = inlined_call_operand.vmem [shape: f32[2,1,128], index: 2, kind: output, shape index: {0}]   ;;  %s738_s3 = inlined_call_operand.vmem [shape: f32[2,1,128], index: 3, kind: output, shape index: {1}]  }
   0x1   :  { %s648_s14 = smov 0   ;;  %s650_s15 = smov 0  }
   0x2   :  { %s652_s16 = smov 0  }
   0x3 LB: > { %s29_s17 = sadd.s32 1, %s611_s14  ;;  %s33_s18 = sadd.s32 1, %s615_s15  ;;  %s619_s16 = sphi %s652_s16, %s14_s16   ;;  %s615_s15 = sphi %s650_s15, %s744_s15   ;;  %s611_s14 = sphi %s648_s14, %s743_s14   ;;  %s607_s13 = sphi %s646_s13, %s742_s13   ;;  %s603_s12 = sphi %s644_s12, %s741_s12  }
   0x4   : > { %p31_p0 = scmp.ge.s32.totalorder %s29_s17, 8  ;;  %p507_p1 = scmp.ge.s32.totalorder %s619_s16, 1 }
   0x5   : > { %p206_p2 = scmp.lt.s32.totalorder %s619_s16, 17 }
   0x6   : > { %s746_s17 = smov (%p31_p0, %s29_s17), 0  ;;  %s748_s18 = smov (!%p31_p0, %s33_s18), %s615_s15 }
   0x7   : > { %p207_p3 = pnand %p507_p1, %p206_p2  ;;  %p35_p4 = scmp.ge.s32.totalorder %s748_s18, 2 }
   0x8   : > { %s508_s19 = sshll.u32 (!%p207_p3), %s607_s13, 3  ;;  %p276_p5 = scmp.lt.s32.totalorder (!%p207_p3), %s607_s13, 1 }
   0x9   : > { %s750_s18 = smov (%p35_p4, %s748_s18), 0  ;;  %210 = sbr.rel (%p207_p3) target bundleno = 189 (0xbd), region = 28 }
   0xa   : > { %s677_s20 = sadd.s32 (!%p207_p3), %s603_s12, %s508_s19  ;;  %p282_p6 = scmp.eq.s32.totalorder (!%p207_p3), %s603_s12, 0 }
   0xb   : > { %p249_p7 = scmp.lt.s32.totalorder (!%p207_p3), %s677_s20, 15 }
  0x10   : > { %s752_s13 = smov (!%p276_p5, %s607_s13), 1  ;;  %287 = sbr.rel (!%p282_p6) target bundleno = 23 (0x17), region = 32 }
  0x11   : > { %s250_s21 = scalar_select %p249_p7, %s677_s20, 15 }
  0x12   : > { %s685_s24 = scalar_lea.vmem %s737_s2, %s752_s13  ;;  %s690_s27 = scalar_lea.vmem %s738_s3, %s752_s13  ;;  %v621_v0 = vmov (%p282_p6), 0.0  }
  0x13   : > { %s754_s21 = smov (!%p249_p7, %s250_s21), 15  ;;  %288 = vst [vmem:[%s685_s24] sm:$0x1] (%p282_p6), %v621_v0  ;;  %289 = vst [vmem:[%s690_s27] sm:$0x1] (%p282_p6), %v621_v0 }
  0x14   : > { %s525_s28 = sshll.u32 %s754_s21, 4 }
  0x15   : > { %s695_s4 = scalar_lea.vmem %s735_s0, %s525_s28  ;;  %s271_s7 = scalar_lea.vmem %s736_s1, %s525_s28 }
  0x17 PF: > { %v293_v1 = vld [vmem:[%s271_s7 + $0x8] sm:$0x1]  ;;  %vm321_vm0 = vcmask 0   ;;  %v292_v2 = vld [vmem:[%s271_s7] sm:$0xff]  ;;  %vm319_vm1 = vcmask 7168   ;;  %v622_v3 = vmov 0  }
  0x18   : > { %571 = vset.pattern.permute.xlu0 %v622_v3  ;;  %v322_v4 = vsel %vm321_vm0, %v293_v1, 0.0  ;;  %v320_v5 = vsel %vm319_vm1, %v292_v2, 0.0  ;;  %572 = vset.pattern.permute.xlu1 %v622_v3  ;;  %v623_v15 = vmov 0.0   ;;  %vm294_vm3 = vcmask 1040384   ;;  %v291_v19 = vld [vmem:[%s695_s4 + $0x8] sm:$0x1] }
  0x19   : > { %343 = vperm.xlu0 %571, %v293_v1   ;;  %v323_v6 = vadd.f32 %v322_v4, %v320_v5  ;;  %v290_v20 = vld [vmem:[%s695_s4] sm:$0xff]  ;;  %v295_v21 = vsel %vm294_vm3, %v291_v19, -inf  ;;  %p377_p8 = scmp.lt.s32.totalorder %s677_s20, 16 }
  0x1a   : > { %v296_v22 = vmax.f32 %v290_v20, %v295_v21  ;;  %v386_v55 = vld [vmem:[%s690_s27] sm:$0x1] }
  0x1b   : > { %v324_v7 = vrot.slane %v323_v6, 4  ;;  %s378_s8 = scalar_select %p377_p8, 1, 0 }
  0x1c   : > { %v297_v23 = vrot.slane %v296_v22, 4 }
  0x1d   : > { %338 = vperm.xlu0 %571, %v292_v2   ;;  %v325_v8 = vadd.f32 %v324_v7, %v323_v6  ;;  %v379_v51 = vstv %s378_s8 }
  0x1e   : > { %v298_v24 = vmax.f32 %v296_v22, %v297_v23  ;;  %vm708_vm4 = vcmp.eq.s32.totalorder %v379_v51, 1 }
  0x1f   : > { %v326_v9 = vrot.slane %v325_v8, 2 }
  0x20   : > { %v299_v25 = vrot.slane %v298_v24, 2 }
  0x21   : > { %v327_v10 = vadd.f32 %v326_v9, %v325_v8 }
  0x22   : > { %v300_v26 = vmax.f32 %v298_v24, %v299_v25 }
  0x23   : > { %v328_v11 = vrot.slane %v327_v10, 1 }
  0x24   : > { %v301_v27 = vrot.slane %v300_v26, 1 }
  0x25   : > { %v329_v12 = vadd.f32 %v328_v11, %v327_v10 }
  0x26   : > { %v302_v28 = vmax.f32 %v300_v26, %v301_v27 }
  0x27   : > { %vm330_vm2 = vcmp.gt.f32.partialorder %v329_v12, 0.0  ;;  %v333_v13 = vmax.f32 %v329_v12, 1.0 }
  0x28   : > { %v331_v14 = vsel %vm330_vm2, 1, %v622_v3  ;;  %v521_v16 = vsel %vm330_vm2, 1.0, %v623_v15  ;;  %v304_v29 = vsub.f32 %v291_v19, %v302_v28  ;;  %v303_v30 = vsub.f32 %v290_v20, %v302_v28  ;;  %v382_v3 = vld [vmem:[%s685_s24] sm:$0x1] }
  0x29   : > { %573 = vrcp.f32 %v333_v13  ;;  %388 = vperm.xlu0 %571, %v331_v14   ;;  %358 = vperm.xlu1 %572, %v521_v16  }
  0x2a   : > { %v307_v31 = vmul.f32 1.442695, %v304_v29  ;;  %v305_v32 = vmul.f32 1.442695, %v303_v30 }
  0x2c   : > { %575 = vpow2.f32 %v307_v31 }
  0x2d   : > { %577 = vpow2.f32 %v305_v32 }
  0x33   : > { %v574_v17 = vpop.eup %573 }
  0x34   : > { %v335_v18 = vsel %vm330_vm2, %v574_v17, 0.0 }
  0x35   : > { %364 = vperm.xlu1 %572, %v335_v18  }
  0x36   : > { %v576_v33 = vpop.eup %575 }
  0x37   : > { %v578_v34 = vpop.eup %577  ;;  %v309_v35 = vsel %vm294_vm3, %v576_v33, 0.0 }
  0x38   : > { %v310_v36 = vadd.f32 %v578_v34, %v309_v35 }
  0x3a   : > { %v311_v37 = vrot.slane %v310_v36, 4 }
  0x3c   : > { %v312_v38 = vadd.f32 %v311_v37, %v310_v36 }
  0x3e   : > { %v313_v39 = vrot.slane %v312_v38, 2 }
  0x40   : > { %v314_v41 = vadd.f32 %v313_v39, %v312_v38 }
  0x42   : > { %v315_v45 = vrot.slane %v314_v41, 1 }
  0x44   : > { %v316_v48 = vadd.f32 %v315_v45, %v314_v41 }
  0x46   : > { %579 = vlog2.f32 %v316_v48 }
  0x50   : > { %v580_v59 = vpop.eup %579 }
  0x51   : > { %v318_v62 = vmul.f32 0.6931472, %v580_v59 }
  0x98   : > { %v344_v40 = vpop.permute.xlu0 %343 }
  0x99   : > { %v347_v42 = vmul.f32 %v344_v40, %v304_v29 }
  0x9b   : > { %v348_v43 = vsel %vm294_vm3, %v347_v42, 0.0 }
  0x9c   : > { %v339_v44 = vpop.permute.xlu0 %338 }
  0x9d   : > { %v346_v46 = vmul.f32 %v339_v44, %v303_v30 }
  0x9f   : > { %v349_v47 = vadd.f32 %v348_v43, %v346_v46 }
  0xa1   : > { %v350_v49 = vrot.slane %v349_v47, 4 }
  0xa3   : > { %v351_v50 = vadd.f32 %v350_v49, %v349_v47 }
  0xa5   : > { %v352_v53 = vrot.slane %v351_v50, 2 }
  0xa7   : > { %v353_v57 = vadd.f32 %v352_v53, %v351_v50 }
  0xa8   : > { %v389_v54 = vpop.permute.xlu0 %388  ;;  %v359_v60 = vpop.permute.xlu1 %358 }
  0xa9   : > { %vm390_vm5 = vcmp.eq.s32.totalorder %v389_v54, 1  ;;  %v354_v61 = vrot.slane %v353_v57, 1  ;;  %v361_v1 = vmul.f32 %v359_v60, %v318_v62 }
  0xaa   : > { %vm391_vm6 = vmand %vm708_vm4, %vm390_vm5 }
  0xab   : > { %v392_v56 = vsel %vm391_vm6, 1.0, %v623_v15  ;;  %v355_v63 = vadd.f32 %v354_v61, %v353_v57 }
  0xac   : > { %v393_v58 = vadd.f32 %v392_v56, %v386_v55 }
  0xae   : > { %394 = vst [vmem:[%s690_s27] sm:$0x1] %v393_v58 }
  0xb4   : > { %v365_v0 = vpop.permute.xlu1 %364 }
  0xb5   : > { %v367_v2 = vmul.f32 %v365_v0, %v355_v63 }
  0xb7   : > { %v368_v4 = vsub.f32 %v361_v1, %v367_v2 }
  0xb9   : > { %v383_v5 = vsel %vm708_vm4, %v368_v4, 0.0 }
  0xba   : > { %v384_v6 = vadd.f32 %v383_v5, %v382_v3 }
  0xbc   : > { %385 = vst [vmem:[%s685_s24] sm:$0x1] %v384_v6 }
  0xbd PF: > { %s14_s16 = sadd.s32 1, %s619_s16   ;;  %s741_s12 = smov %s611_s14 }
  0xbe   : > { %p11_p9 = scmp.ge.s32.totalorder %s14_s16, 18   ;;  %s742_s13 = smov %s615_s15 }
  0xbf   : > { %s743_s14 = smov %s746_s17  ;;  %s744_s15 = smov %s750_s18 }
  0xc0   :  { %13 = sbr.rel (!%p11_p9) target bundleno = 3 (0x3), region = 77 }

</bundles_post_ra>
